<compile_context>
chip_gen: v5e
topology: v5e:2x2
jax: 0.10.0
libtpu: 0.0.40
codegen_flags: <defaults>
</compile_context>

<pallas_src>
import functools

import jax
import jax.numpy as jnp
from jax.experimental import pallas as pl
from jax.experimental.pallas import tpu as pltpu


def _round_up(x: int, m: int) -> int:
    return ((x + m - 1) // m) * m


def dec_kernel(x_ref, w_ref, ct_ref, csq_ref, mask_ref, q_ref, *, alpha: float):
    mm_dtype = w_ref.dtype

    # Encoder (bias folded into centers): zw = X @ W          (TB, D_pad), f32 acc
    zw = jnp.dot(x_ref[...], w_ref[...], preferred_element_type=jnp.float32)

    # ||zw - c'||^2 = ||zw||^2 + ||c'||^2 - 2 zw @ c'^T       (TB, K_pad)
    zw_sq = jnp.sum(zw * zw, axis=-1, keepdims=True)           # (TB, 1)
    zc = jnp.dot(zw.astype(mm_dtype), ct_ref[...],
                 preferred_element_type=jnp.float32)           # (TB, K_pad)
    squared_norm = jnp.maximum(zw_sq + csq_ref[...] - 2.0 * zc, 0.0)

    # Student's t-distribution kernel (ClusteringLayer.forward).
    if alpha == 1.0:
        # Exponent is exactly -1: a single reciprocal, no pow on the EUP.
        numerator = pl.reciprocal(1.0 + squared_norm, approx=False)
    else:
        numerator = (1.0 + squared_norm * (1.0 / alpha)) ** (-(alpha + 1.0) / 2.0)

    # Zero out padded (non-existent) clusters before normalization.
    numerator = numerator * mask_ref[...]
    denom = jnp.sum(numerator, axis=-1, keepdims=True)
    q_ref[...] = numerator * pl.reciprocal(denom, approx=False)


def dec_forward(x, w, b, centers, alpha=1.0, *, block_b=512, matmul_dtype=None):
    B, F = x.shape
    Fw, D = w.shape
    K, Dc = centers.shape
    assert Fw == F and Dc == D
    assert block_b % 8 == 0

    mm_dtype = jnp.dtype(matmul_dtype) if matmul_dtype is not None else jnp.dtype(x.dtype)

    # Pad latent and cluster dims to 128 lanes (zero padding is exact:
    # zero columns contribute nothing to dot products or norms).
    D_pad = _round_up(D, 128)
    K_pad = _round_up(K, 128)

    # Fold the encoder bias into the centers: ||xW + b - c||^2 = ||xW - (c-b)||^2.
    c_shift = centers.astype(jnp.float32) - b.reshape(1, D).astype(jnp.float32)

    w_p = jnp.zeros((F, D_pad), jnp.float32).at[:, :D].set(w.astype(jnp.float32))
    c_p = jnp.zeros((K_pad, D_pad), jnp.float32).at[:K, :D].set(c_shift)

    # Hoisted centers-side constants (computed once, VMEM-resident in-kernel).
    c_sq = jnp.sum(c_p * c_p, axis=-1, keepdims=True).T          # (1, K_pad) f32
    c_t = c_p.T.astype(mm_dtype)                                  # (D_pad, K_pad)
    mask = (jnp.arange(K_pad) < K).astype(jnp.float32)[None, :]   # (1, K_pad)

    x_mm = x.astype(mm_dtype)
    w_mm = w_p.astype(mm_dtype)

    # Batch tile: as large as VMEM comfortably allows, multiple of 8 sublanes
    # (default 512 keeps the MXU M dim a multiple of 256 on v6e/v7x).
    TB = B if B <= block_b else block_b
    grid = (pl.cdiv(B, TB),)

    # Rough double-buffered VMEM footprint; cap for the v7x 64 MiB ceiling.
    itm = jnp.dtype(mm_dtype).itemsize
    est = (2 * TB * F * itm            # x tiles (double-buffered)
           + 2 * TB * K_pad * 4        # q tiles (double-buffered)
           + 2 * F * D_pad * itm       # W (resident)
           + 2 * D_pad * K_pad * itm   # c'^T (resident)
           + 4 * 2 * K_pad * 4)        # ||c'||^2 + mask
    vmem_limit = int(min(max(2 * est, 32 * 1024 * 1024), 64 * 1024 * 1024))

    kernel = functools.partial(dec_kernel, alpha=float(alpha))

    q_pad = pl.pallas_call(
        kernel,
        out_shape=jax.ShapeDtypeStruct((B, K_pad), jnp.float32),
        grid=grid,
        in_specs=[
            pl.BlockSpec((TB, F), lambda i: (i, 0)),          # x tile
            pl.BlockSpec((F, D_pad), lambda i: (0, 0)),       # W        (resident)
            pl.BlockSpec((D_pad, K_pad), lambda i: (0, 0)),   # c'^T     (resident)
            pl.BlockSpec((1, K_pad), lambda i: (0, 0)),       # ||c'||^2 (resident)
            pl.BlockSpec((1, K_pad), lambda i: (0, 0)),       # cluster mask
        ],
        out_specs=pl.BlockSpec((TB, K_pad), lambda i: (i, 0)),
        compiler_params=pltpu.CompilerParams(
            dimension_semantics=("parallel",),
            vmem_limit_bytes=vmem_limit,
        ),
    )(x_mm, w_mm, c_t, c_sq, mask)

    return q_pad[:, :K]


def dec_reference(x, w, b, centers, alpha=1.0):
    """Pure-JAX reference mirroring the PyTorch module exactly."""
    z = x @ w + b.reshape(1, -1)                            # encoder
    diff = z[:, None, :] - centers[None, :, :]              # z.unsqueeze(1) - centers
    squared_norm = jnp.sum(diff ** 2, axis=2)
    numerator = (1.0 + squared_norm / alpha) ** (-(alpha + 1) / 2)
    return numerator / jnp.sum(numerator, axis=1, keepdims=True)


if __name__ == "__main__":
    # Small, deterministic shapes.
    B, F, D, K = 8, 32, 16, 4          # batch, input features, latent_dim, n_clusters
    alpha = 1.0

    key = jax.random.PRNGKey(0)
    kx, kw, kb, kc = jax.random.split(key, 4)

    x = jax.random.normal(kx, (B, F), dtype=jnp.float32)
    w = jax.random.normal(kw, (F, D), dtype=jnp.float32) * 0.1   # Linear F -> D
    b = jax.random.normal(kb, (1, D), dtype=jnp.float32) * 0.01
    centers = jax.random.normal(kc, (K, D), dtype=jnp.float32)

    q_ref = dec_reference(x, w, b, centers, alpha)

    # f32 MXU path: tight correctness check against the PyTorch-equivalent ref.
    q = dec_forward(x, w, b, centers, alpha)
    jax.block_until_ready(q)
    assert q.shape == (B, K)
    assert jnp.allclose(jnp.sum(q, axis=1), 1.0, atol=1e-5)
    assert jnp.allclose(q, q_ref, atol=1e-5, rtol=1e-5)

    # bf16 MXU-input path (v6e/v7x perf mode): looser tolerance, exact row sums.
    q_bf16 = dec_forward(x, w, b, centers, alpha, matmul_dtype=jnp.bfloat16)
    jax.block_until_ready(q_bf16)
    assert q_bf16.shape == (B, K)
    assert jnp.allclose(jnp.sum(q_bf16, axis=1), 1.0, atol=1e-4)
    assert jnp.allclose(q_bf16, q_ref, atol=1e-1)

    print("KERNEL_OK")
</pallas_src>

<mosaic_0001>
module attributes {stable_mosaic.version = 11 : i64} {
  func.func @dec_kernel(%arg0: i32, %arg1: memref<8x32xf32, #tpu.memory_space<vmem>>, %arg2: memref<32x128xf32, #tpu.memory_space<vmem>>, %arg3: memref<128x128xf32, #tpu.memory_space<vmem>>, %arg4: memref<1x128xf32, #tpu.memory_space<vmem>>, %arg5: memref<1x128xf32, #tpu.memory_space<vmem>>, %arg6: memref<8x128xf32, #tpu.memory_space<vmem>>) attributes {dimension_semantics = [#tpu.dimension_semantics<parallel>], iteration_bounds = array<i64: 1>, scalar_prefetch = 0 : i64, scratch_operands = 0 : i64, tpu.core_type = #tpu.core_type<tc>, window_params = [{transform_indices = @transform_0, window_bounds = array<i64: 8, 32>}, {pipeline_mode = #tpu.pipeline_mode<synchronous>, transform_indices = @transform_1, window_bounds = array<i64: 32, 128>}, {pipeline_mode = #tpu.pipeline_mode<synchronous>, transform_indices = @transform_2, window_bounds = array<i64: 128, 128>}, {pipeline_mode = #tpu.pipeline_mode<synchronous>, transform_indices = @transform_3, window_bounds = array<i64: 1, 128>}, {pipeline_mode = #tpu.pipeline_mode<synchronous>, transform_indices = @transform_4, window_bounds = array<i64: 1, 128>}, {transform_indices = @transform_5, window_bounds = array<i64: 8, 128>}]} {
    %c0 = arith.constant 0 : index
    %c0_0 = arith.constant 0 : index
    %0 = vector.load %arg1[%c0, %c0_0] : memref<8x32xf32, #tpu.memory_space<vmem>>, vector<8x32xf32>
    %c0_1 = arith.constant 0 : index
    %c0_2 = arith.constant 0 : index
    %1 = vector.load %arg2[%c0_1, %c0_2] : memref<32x128xf32, #tpu.memory_space<vmem>>, vector<32x128xf32>
    %cst = arith.constant dense<0.000000e+00> : vector<8x128xf32>
    %2 = tpu.matmul %0, %1, %cst {dimension_numbers = #tpu.dot_dimension_numbers<[1], [0], [0], [1], [0, 0, 1, 1], [], []>} : vector<8x32xf32>, vector<32x128xf32>, vector<8x128xf32> -> vector<8x128xf32>
    %3 = arith.mulf %2, %2 : vector<8x128xf32>
    %cst_3 = arith.constant dense<0.000000e+00> : vector<8xf32>
    %4 = vector.multi_reduction <add>, %3, %cst_3 [1] : vector<8x128xf32> to vector<8xf32>
    %5 = vector.shape_cast %4 : vector<8xf32> to vector<8x1xf32>
    %c0_4 = arith.constant 0 : index
    %c0_5 = arith.constant 0 : index
    %6 = vector.load %arg3[%c0_4, %c0_5] : memref<128x128xf32, #tpu.memory_space<vmem>>, vector<128x128xf32>
    %cst_6 = arith.constant dense<0.000000e+00> : vector<8x128xf32>
    %7 = tpu.matmul %2, %6, %cst_6 {dimension_numbers = #tpu.dot_dimension_numbers<[1], [0], [0], [1], [0, 0, 1, 1], [], []>} : vector<8x128xf32>, vector<128x128xf32>, vector<8x128xf32> -> vector<8x128xf32>
    %c0_7 = arith.constant 0 : index
    %c0_8 = arith.constant 0 : index
    %8 = vector.load %arg4[%c0_7, %c0_8] : memref<1x128xf32, #tpu.memory_space<vmem>>, vector<1x128xf32>
    %9 = vector.broadcast %5 : vector<8x1xf32> to vector<8x128xf32>
    %10 = vector.broadcast %8 : vector<1x128xf32> to vector<8x128xf32>
    %11 = arith.addf %9, %10 : vector<8x128xf32>
    %cst_9 = arith.constant 2.000000e+00 : f32
    %12 = vector.broadcast %cst_9 : f32 to vector<8x128xf32>
    %13 = arith.mulf %12, %7 : vector<8x128xf32>
    %14 = arith.subf %11, %13 : vector<8x128xf32>
    %cst_10 = arith.constant 0.000000e+00 : f32
    %15 = vector.broadcast %cst_10 : f32 to vector<8x128xf32>
    %16 = arith.maximumf %14, %15 : vector<8x128xf32>
    %cst_11 = arith.constant 1.000000e+00 : f32
    %17 = vector.broadcast %cst_11 : f32 to vector<8x128xf32>
    %18 = arith.addf %17, %16 : vector<8x128xf32>
    %19 = tpu.reciprocal %18 : vector<8x128xf32> -> vector<8x128xf32>
    %c0_12 = arith.constant 0 : index
    %c0_13 = arith.constant 0 : index
    %20 = vector.load %arg5[%c0_12, %c0_13] : memref<1x128xf32, #tpu.memory_space<vmem>>, vector<1x128xf32>
    %21 = vector.broadcast %20 : vector<1x128xf32> to vector<8x128xf32>
    %22 = arith.mulf %19, %21 : vector<8x128xf32>
    %cst_14 = arith.constant dense<0.000000e+00> : vector<8xf32>
    %23 = vector.multi_reduction <add>, %22, %cst_14 [1] : vector<8x128xf32> to vector<8xf32>
    %24 = vector.shape_cast %23 : vector<8xf32> to vector<8x1xf32>
    %25 = tpu.reciprocal %24 : vector<8x1xf32> -> vector<8x1xf32>
    %26 = vector.broadcast %25 : vector<8x1xf32> to vector<8x128xf32>
    %27 = arith.mulf %22, %26 : vector<8x128xf32>
    %c0_15 = arith.constant 0 : index
    %c0_16 = arith.constant 0 : index
    %28 = vector.load %arg6[%c0_15, %c0_16] : memref<8x128xf32, #tpu.memory_space<vmem>>, vector<8x128xf32>
    tpu.vector_store %arg6[%c0_15, %c0_16], %27 {strides = array<i32>} : memref<8x128xf32, #tpu.memory_space<vmem>>, vector<8x128xf32>,
    return
  }
  func.func @transform_0(%arg0: i32) -> (i32, i32) {
    %c0_i32 = arith.constant 0 : i32
    %c0_i32_0 = arith.constant 0 : i32
    return %arg0, %c0_i32 : i32, i32
  }
  func.func @transform_1(%arg0: i32) -> (i32, i32) {
    %c0_i32 = arith.constant 0 : i32
    %c0_i32_0 = arith.constant 0 : i32
    %c0_i32_1 = arith.constant 0 : i32
    return %c0_i32, %c0_i32_0 : i32, i32
  }
  func.func @transform_2(%arg0: i32) -> (i32, i32) {
    %c0_i32 = arith.constant 0 : i32
    %c0_i32_0 = arith.constant 0 : i32
    %c0_i32_1 = arith.constant 0 : i32
    return %c0_i32, %c0_i32_0 : i32, i32
  }
  func.func @transform_3(%arg0: i32) -> (i32, i32) {
    %c0_i32 = arith.constant 0 : i32
    %c0_i32_0 = arith.constant 0 : i32
    %c0_i32_1 = arith.constant 0 : i32
    return %c0_i32, %c0_i32_0 : i32, i32
  }
  func.func @transform_4(%arg0: i32) -> (i32, i32) {
    %c0_i32 = arith.constant 0 : i32
    %c0_i32_0 = arith.constant 0 : i32
    %c0_i32_1 = arith.constant 0 : i32
    return %c0_i32, %c0_i32_0 : i32, i32
  }
  func.func @transform_5(%arg0: i32) -> (i32, i32) {
    %c0_i32 = arith.constant 0 : i32
    %c0_i32_0 = arith.constant 0 : i32
    return %arg0, %c0_i32 : i32, i32
  }
}

</mosaic_0001>

<bundles_post_ra>
// kernel: tpu_custom_call.1
= control target key start
LH: loop header
LB: loop body
LE: loop exit
PB: predicated region body
PF: predicated region fallthrough
CT: control target
= control target key end

     0   :  { %10 = vsyncpa [#allocation3], 0  ;;  %s367_s0 = inlined_call_operand.hbm [shape: f32[8,32], index: 0, kind: input, shape index: {}]   ;;  %s368_s1 = inlined_call_operand.hbm [shape: f32[32,128], index: 1, kind: input, shape index: {}]   ;;  %s369_s2 = inlined_call_operand.hbm [shape: f32[128,128], index: 2, kind: input, shape index: {}]   ;;  %s370_s3 = inlined_call_operand.vmem [shape: f32[1,128], index: 3, kind: input, shape index: {}]   ;;  %s371_s4 = inlined_call_operand.vmem [shape: f32[1,128], index: 4, kind: input, shape index: {}]   ;;  %s372_s5 = inlined_call_operand.hbm [shape: f32[8,128], index: 5, kind: output, shape index: {}]  }
   0x1   :  { %11 = vsyncpa [#allocation6], 0  ;;  %s28_s20 = sshll.u32 %s368_s1, 4  ;;  %s29_s20 = int_to_ptr.hbm [resolvable:$true] %s28_s20 }
   0x2   :  { %12 = vsyncpa [#allocation4], 0  ;;  %s313_s21 = smov [#allocation5]   ;;  %s18_s25 = sshll.u32 %s367_s0, 4  ;;  %s19_s25 = int_to_ptr.hbm [resolvable:$true] %s18_s25 }
   0x3   :  { %s30_s22 = sshll.u32 %s313_s21, 4  ;;  %s314_s26 = smov 128   ;;  %s31_s22 = int_to_ptr.vmem [resolvable:$true] %s30_s22 }
   0x4   :  { %s315_s27 = smov 8   ;;  %s316_s28 = smov [#allocation2]  }
   0x5   :  { %36 = dma.hbm_to_vmem [thread:$0]  %s29_s20, 512, %s31_s22, [#allocation6], %s314_s26, %s314_s26, %s315_s27  }
   0x6   :  { %s20_s29 = sshll.u32 %s316_s28, 4  ;;  %s41_s7 = sshll.u32 %s369_s2, 4  ;;  %s21_s29 = int_to_ptr.vmem [resolvable:$true] %s20_s29  ;;  %s42_s7 = int_to_ptr.hbm [resolvable:$true] %s41_s7 }
   0x7   :  { %23 = dma.hbm_to_vmem [thread:$0]  %s19_s25, 128, %s21_s29, [#allocation3]  }
   0x8   :  { %s317_s1 = smov [#allocation7]  }
   0x9   :  { %s43_s8 = sshll.u32 %s317_s1, 4  ;;  %s44_s8 = int_to_ptr.vmem [resolvable:$true] %s43_s8 }
   0xa   :  { %49 = dma.hbm_to_vmem [thread:$0]  %s42_s7, 2048, %s44_s8, [#allocation6], %s314_s26, %s314_s26, %s315_s27  }
   0xb   :  { %307 = dma.done.wait [#allocation3], 128  }
   0xc   :  { %308 = vsyncadd [#allocation3], 4294967168 }
   0xd   :  { %309 = dma.done.wait [#allocation6], 2560  }
   0xe   :  { %310 = vsyncadd [#allocation6], 4294964736  ;;  %v70_v0 = vld [vmem:[#allocation5 + $0x18] sm:$0xff]  ;;  %v69_v1 = vld [vmem:[#allocation5 + $0x10] sm:$0xff]  ;;  %vm71_vm0 = vcmask 261120   ;;  %s187_s13 = sshll.u32 %s372_s5, 4  ;;  %s188_s13 = int_to_ptr.hbm [resolvable:$true] %s187_s13 }
   0xf   :  { %87 = vmatpush.msra.mxu0 %v70_v0  ;;  %v113_v2 = vld [vmem:[#allocation7 + $0x78] sm:$0xff]  ;;  %v68_v3 = vld [vmem:[#allocation5 + $0x8] sm:$0xff]  ;;  %v112_v4 = vld [vmem:[#allocation7 + $0x70] sm:$0xff] }
  0x10   :  { %114 = vmatpush.msra.mxu1 %v113_v2  ;;  %v111_v5 = vld [vmem:[#allocation7 + $0x68] sm:$0xff]  ;;  %v67_v6 = vld [vmem:[#allocation5] sm:$0xff]  ;;  %v66_v7 = vld [vmem:[#allocation2] sm:$0xff] }
  0x11   :  { %88 = vmatpush.msra.mxu0 %v69_v1  ;;  %v110_v8 = vld [vmem:[#allocation7 + $0x60] sm:$0xff]  ;;  %v109_v9 = vld [vmem:[#allocation7 + $0x58] sm:$0xff]  ;;  %v108_v10 = vld [vmem:[#allocation7 + $0x50] sm:$0xff] }
  0x12   :  { %115 = vmatpush.msra.mxu1 %v112_v4  ;;  %v107_v11 = vld [vmem:[#allocation7 + $0x48] sm:$0xff]  ;;  %v106_v12 = vld [vmem:[#allocation7 + $0x40] sm:$0xff]  ;;  %v105_v13 = vld [vmem:[#allocation7 + $0x38] sm:$0xff] }
  0x13   :  { %89 = vmatpush.msra.mxu0 %v68_v3  ;;  %v104_v14 = vld [vmem:[#allocation7 + $0x30] sm:$0xff]  ;;  %v103_v15 = vld [vmem:[#allocation7 + $0x28] sm:$0xff]  ;;  %v102_v16 = vld [vmem:[#allocation7 + $0x20] sm:$0xff] }
  0x14   :  { %116 = vmatpush.msra.mxu1 %v111_v5  ;;  %v101_v17 = vld [vmem:[#allocation7 + $0x18] sm:$0xff]  ;;  %v100_v18 = vld [vmem:[#allocation7 + $0x10] sm:$0xff]  ;;  %v99_v19 = vld [vmem:[#allocation7 + $0x8] sm:$0xff] }
  0x15   :  { %90 = vmatpush.msra.mxu0 %v67_v6  ;;  %v98_v20 = vld [vmem:[#allocation7] sm:$0xff]  ;;  %v205_v23 = vld [vmem:[%s370_s3] ss:$0 sm:$0xff]  ;;  %s318_s3 = smov [#allocation8]  }
  0x16   :  { %198 = vmatmul.msk.f32.vlgmr.msra.gmra.mxu0 %vm71_vm0, %v66_v7  ;;  %117 = vmatpush.msra.mxu1 %v110_v8  ;;  %v206_v38 = vld [vmem:[%s371_s4] ss:$0 sm:$0xff]  ;;  %s185_s4 = sshll.u32 %s318_s3, 4  ;;  %s186_s4 = int_to_ptr.vmem [resolvable:$true] %s185_s4 }
  0x18   :  { %118 = vmatpush.msra.mxu1 %v109_v9 }
  0x1a   :  { %119 = vmatpush.msra.mxu1 %v108_v10 }
  0x1c   :  { %120 = vmatpush.msra.mxu1 %v107_v11 }
  0x1e   :  { %121 = vmatpush.msra.mxu1 %v106_v12 }
  0x20   :  { %122 = vmatpush.msra.mxu1 %v105_v13 }
  0x22   :  { %123 = vmatpush.msra.mxu1 %v104_v14 }
  0x24   :  { %124 = vmatpush.msra.mxu1 %v103_v15 }
  0x26   :  { %125 = vmatpush.msra.mxu1 %v102_v16 }
  0x28   :  { %126 = vmatpush.msra.mxu1 %v101_v17 }
  0x2a   :  { %127 = vmatpush.msra.mxu1 %v100_v18 }
  0x2c   :  { %128 = vmatpush.msra.mxu1 %v99_v19 }
  0x2e   :  { %129 = vmatpush.msra.mxu1 %v98_v20 }
  0x93   :  { %v92_v21 = vpop.f32.mrf.mxu0 }
  0x94   :  { %130 = vmatmul.f32.vlgmr.msra.gmra.mxu1 %v92_v21  ;;  %v95_v22 = vmul.f32 %v92_v21, %v92_v21 }
  0x96   :  { %96 = vadd.xlane.f32.xlu0 %v95_v22 }
 0x109   :  { %v97_v24 = vpop.xlane.xlu0 %96 }
 0x10a   :  { %v138_v26 = vadd.f32 %v205_v23, %v97_v24 }
 0x111   :  { %v131_v25 = vpop.f32.mrf.mxu1 }
 0x112   :  { %v139_v27 = vmul.f32 2.0, %v131_v25 }
 0x114   :  { %v140_v28 = vsub.f32 %v138_v26, %v139_v27 }
 0x116   :  { %v141_v29 = vmax.f32 %v140_v28, 0.0 }
 0x118   :  { %v142_v30 = vadd.f32 1.0, %v141_v29 }
 0x11a   :  { %207 = vrcp.f32 %v142_v30  ;;  %v154_v34 = vand.u32 2147483648, %v142_v30  ;;  %v152_v36 = vand.u32 2147483647, %v142_v30  ;;  %vm148_vm2 = vweird.f32 %v142_v30 }
 0x11c   :  { %v155_v39 = vor.u32 1.1754944e-38, %v154_v34  ;;  %vm153_vm4 = vcmp.eq.f32.partialorder %v152_v36, 8.507059e+37 }
 0x120   :  { %v208_v31 = vpop.eup %207 }
 0x121   :  { %v144_v32 = vmul.f32 %v208_v31, %v142_v30  ;;  %vm149_vm1 = vweird.f32 %v208_v31 }
 0x122   :  { %vm150_vm3 = vmor %vm148_vm2, %vm149_vm1 }
 0x123   :  { %v145_v33 = vsub.f32 1.0, %v144_v32 }
 0x125   :  { %v146_v35 = vmul.f32 %v208_v31, %v145_v33 }
 0x127   :  { %v147_v37 = vadd.f32 %v208_v31, %v146_v35 }
 0x129   :  { %v151_v40 = vsel %vm150_vm3, %v208_v31, %v147_v37 }
 0x12a   :  { %v156_v41 = vsel %vm153_vm4, %v155_v39, %v151_v40 }
 0x12b   :  { %v161_v42 = vmul.f32 %v206_v38, %v156_v41 }
 0x12d   :  { %162 = vadd.xlane.f32.xlu0 %v161_v42 }
 0x1a0   :  { %v163_v43 = vpop.xlane.xlu0 %162 }
 0x1a1   :  { %209 = vrcp.f32 %v163_v43  ;;  %v175_v47 = vand.u32 2147483648, %v163_v43  ;;  %v173_v49 = vand.u32 2147483647, %v163_v43  ;;  %vm169_vm6 = vweird.f32 %v163_v43 }
 0x1a3   :  { %v176_v51 = vor.u32 1.1754944e-38, %v175_v47  ;;  %vm174_vm8 = vcmp.eq.f32.partialorder %v173_v49, 8.507059e+37 }
 0x1a7   :  { %v210_v44 = vpop.eup %209 }
 0x1a8   :  { %v165_v45 = vmul.f32 %v210_v44, %v163_v43  ;;  %vm170_vm5 = vweird.f32 %v210_v44 }
 0x1a9   :  { %vm171_vm7 = vmor %vm169_vm6, %vm170_vm5 }
 0x1aa   :  { %v166_v46 = vsub.f32 1.0, %v165_v45 }
 0x1ac   :  { %v167_v48 = vmul.f32 %v210_v44, %v166_v46 }
 0x1ae   :  { %v168_v50 = vadd.f32 %v210_v44, %v167_v48 }
 0x1b0   :  { %v172_v52 = vsel %vm171_vm7, %v210_v44, %v168_v50 }
 0x1b1   :  { %v177_v53 = vsel %vm174_vm8, %v176_v51, %v172_v52 }
 0x1b2   :  { %v178_v54 = vmul.f32 %v177_v53, %v161_v42 }
 0x1b4   :  { %179 = vst [vmem:[#allocation8] sm:$0xff] %v178_v54 }
 0x1b5   :  { %190 = dma.vmem_to_hbm [thread:$0]  %s186_s4, 128, %s188_s13, [#allocation4]  }
 0x1b6   :  { %311 = dma.done.wait [#allocation4], 128  }
 0x1b7   :  { %312 = vsyncadd [#allocation4], 4294967168 }
 0x1b8   :  { %195 = vsyncpa [#allocation3], 1 }
 0x1b9   :  { %196 = vsyncpa [#allocation6], 1 }
 0x1ba   :  { %197 = vsyncpa [#allocation4], 1 }

</bundles_post_ra>
